<compile_context>
chip_gen: v7x
topology: tpu7x:2x2x1
jax: 0.10.0
libtpu: 0.0.40
codegen_flags: <defaults>
</compile_context>

<pallas_src>
import math
import functools

import jax
import jax.numpy as jnp
from jax.experimental import pallas as pl
from jax.experimental.pallas import tpu as pltpu

_LANE = 128
_SUBLANE = 8
_DMA_GROUP = 8                        # rows per DMA group on the HBM-gather path
_VMEM_TABLE_LIMIT = 8 * 1024 * 1024   # keep the table VMEM-resident below this
_TILE_VMEM_BUDGET = 12 * 1024 * 1024  # budget for gather buf + pos/out dbl-buffers


def _round_up(x, m):
    return (x + m - 1) // m * m


def sinusoidal_positional_encoding(max_len, d_model, dtype=jnp.float32):
    pos = jnp.arange(max_len, dtype=jnp.float32)[:, None]          # (L, 1)
    i = jnp.arange(0, d_model, 2, dtype=jnp.float32)[None, :]      # (1, D/2)
    div = jnp.exp(-i * (math.log(10000.0) / d_model))               # (1, D/2)
    angles = pos * div                                              # (L, D/2)
    pe = jnp.zeros((max_len, d_model), dtype=jnp.float32)
    pe = pe.at[:, 0::2].set(jnp.sin(angles))
    pe = pe.at[:, 1::2].set(jnp.cos(angles))
    return pe.astype(dtype)


def _embed_vmem_table_kernel(ids_ref, table_ref, pos_ref, out_ref, gather_ref,
                             *, tile_s, seq_pad, scale):
    """Small-vocab path: whole embedding table resident in VMEM.

    ids_ref:    (B * seq_pad,)   int32 SMEM (scalar-prefetched token ids, flat)
    table_ref:  (V_pad, D_pad)   f32 VMEM, constant index_map -> loaded once
    pos_ref:    (tile_s, D_pad)  f32 VMEM positional tile
    out_ref:    (tile_s, D_pad)  output tile (batch dim squeezed)
    gather_ref: (tile_s, D_pad)  f32 VMEM scratch holding the gathered rows
    """
    ji = pl.program_id(0)   # seq tile (outer grid axis)
    bi = pl.program_id(1)   # batch    (inner grid axis)
    base = bi * seq_pad + ji * tile_s

    def gather_row(r, carry):
        tok = ids_ref[base + r]
        gather_ref[pl.ds(r, 1), :] = table_ref[pl.ds(tok, 1), :]
        return carry

    jax.lax.fori_loop(0, tile_s, gather_row, 0, unroll=min(tile_s, 8))

    # Fused epilogue on the VPU: scale + positional-encoding add (f32 math).
    out_ref[...] = (gather_ref[...] * scale + pos_ref[...]).astype(out_ref.dtype)
    # TODO(synk): training-mode dropout (pltpu.prng_seed / prng_random_bits
    # masking) not implemented; this matches eval-mode nn.Dropout (identity).


def _embed_hbm_table_kernel(ids_ref, table_hbm, pos_ref, out_ref,
                            gather_ref, sems, *, tile_s, seq_pad, scale, group):
    """Large-vocab fallback: table stays in HBM, rows gathered with grouped DMAs.

    sems: (group,) DMA semaphores, reused for every group of `group` rows.
    """
    ji = pl.program_id(0)
    bi = pl.program_id(1)
    base = bi * seq_pad + ji * tile_s

    def do_group(g, carry):
        row0 = g * group
        # Issue `group` row DMAs (static semaphore index per row in the group),
        # then wait on the whole group -> no fully unrolled start/wait chain.
        for r in range(group):
            tok = ids_ref[base + row0 + r]
            pltpu.make_async_copy(table_hbm.at[pl.ds(tok, 1)],
                                  gather_ref.at[pl.ds(row0 + r, 1)],
                                  sems.at[r]).start()
        for r in range(group):
            tok = ids_ref[base + row0 + r]
            pltpu.make_async_copy(table_hbm.at[pl.ds(tok, 1)],
                                  gather_ref.at[pl.ds(row0 + r, 1)],
                                  sems.at[r]).wait()
        return carry

    jax.lax.fori_loop(0, tile_s // group, do_group, 0)

    out_ref[...] = (gather_ref[...] * scale + pos_ref[...]).astype(out_ref.dtype)
    # TODO(synk): cross-grid-step pipelining of the row gather (double-buffered
    # gather_ref / sems) would hide the remaining DMA latency for huge vocabs.


def input_embedding_forward(token_ids, table, pos_enc, d_model,
                            out_dtype=jnp.float32):
    """token_ids: (B, S) int; table: (V, D) f32; pos_enc: (max_len, D) f32.
    Returns (B, S, D) in `out_dtype` (f32 by default to match the PyTorch
    module; pass jnp.bfloat16 to halve output writeback bytes)."""
    b, s = token_ids.shape
    v, d = table.shape
    assert d == d_model
    scale = math.sqrt(d_model)
    out_bytes = jnp.dtype(out_dtype).itemsize

    # Lane/sublane-dense padding -> unmasked vector stores.
    d_pad = _round_up(d, _LANE)
    v_pad = _round_up(v, _SUBLANE)

    # VMEM-budget-aware seq tile (gather scratch + double-buffered pos/out).
    per_row = d_pad * (4 + 2 * 4 + 2 * out_bytes)
    tile_cap = max(_SUBLANE,
                   (_TILE_VMEM_BUDGET // per_row) // _SUBLANE * _SUBLANE)
    tile_s = min(512, tile_cap, _round_up(s, _SUBLANE))
    seq_pad = _round_up(s, tile_s)
    grid = (seq_pad // tile_s, b)   # batch innermost -> positional tile reused

    # Clamp ids (PyTorch nn.Embedding raises on OOB; we clamp to stay in-bounds
    # since only DMA bounds checks are enabled by default), pad and flatten.
    ids = jnp.clip(token_ids.astype(jnp.int32), 0, v - 1)
    ids = jnp.pad(ids, ((0, 0), (0, seq_pad - s)))
    ids_flat = ids.reshape(-1)

    table_p = jnp.pad(table.astype(jnp.float32),
                      ((0, v_pad - v), (0, d_pad - d)))
    pos = pos_enc[:min(seq_pad, pos_enc.shape[0]), :].astype(jnp.float32)
    pos = jnp.pad(pos, ((0, seq_pad - pos.shape[0]), (0, d_pad - d)))

    table_bytes = v_pad * d_pad * 4
    use_vmem_table = table_bytes <= _VMEM_TABLE_LIMIT
    tile_footprint = tile_s * per_row

    scratch_shapes = [pltpu.VMEM((tile_s, d_pad), jnp.float32)]
    if use_vmem_table:
        kernel = functools.partial(_embed_vmem_table_kernel,
                                   tile_s=tile_s, seq_pad=seq_pad, scale=scale)
        # Whole table, constant block index -> DMAed into VMEM once, reused.
        table_spec = pl.BlockSpec((v_pad, d_pad), lambda ji, bi, ids_sref: (0, 0))
        vmem_needed = 2 * table_bytes + tile_footprint  # BlockSpec double-buffers
    else:
        kernel = functools.partial(_embed_hbm_table_kernel,
                                   tile_s=tile_s, seq_pad=seq_pad, scale=scale,
                                   group=_DMA_GROUP)
        table_spec = pl.BlockSpec(memory_space=pl.ANY)  # manual DMA row gather
        scratch_shapes.append(pltpu.SemaphoreType.DMA((_DMA_GROUP,)))
        vmem_needed = tile_footprint

    vmem_limit = min(48 * 1024 * 1024,
                     max(16 * 1024 * 1024, vmem_needed + 4 * 1024 * 1024))

    out = pl.pallas_call(
        kernel,
        out_shape=jax.ShapeDtypeStruct((b, seq_pad, d_pad), out_dtype),
        grid_spec=pltpu.PrefetchScalarGridSpec(
            num_scalar_prefetch=1,          # token ids -> SMEM
            grid=grid,
            in_specs=[
                table_spec,
                # Positional tile depends only on the seq-tile index; with the
                # batch axis innermost, it is not re-DMAed B times.
                pl.BlockSpec((tile_s, d_pad), lambda ji, bi, ids_sref: (ji, 0)),
            ],
            out_specs=pl.BlockSpec((None, tile_s, d_pad),
                                   lambda ji, bi, ids_sref: (bi, ji, 0)),
            scratch_shapes=scratch_shapes,
        ),
        compiler_params=pltpu.CompilerParams(
            dimension_semantics=("parallel", "parallel"),
            vmem_limit_bytes=vmem_limit),
    )(ids_flat, table_p, pos)

    return out[:, :s, :d]


if __name__ == "__main__":
    # Small shapes consistent with the module; d_model = 128 keeps the output
    # lane-dense without padding.
    vocab_size = 64
    d_model = 128
    max_len = 16
    batch, seq = 2, 8
    dropout_rate = 0.1  # eval mode -> identity

    key = jax.random.PRNGKey(0)
    k_tok, k_emb = jax.random.split(key)

    # Deterministic parameter init: nn.Embedding weight ~ N(0, 1).
    table = jax.random.normal(k_emb, (vocab_size, d_model), dtype=jnp.float32)
    pos_enc = sinusoidal_positional_encoding(max_len, d_model)

    token_ids = jax.random.randint(k_tok, (batch, seq), 0, vocab_size,
                                   dtype=jnp.int32)

    out = input_embedding_forward(token_ids, table, pos_enc, d_model)
    out = jax.block_until_ready(out)

    # Reference check in plain JAX (same eval-mode semantics).
    ref = table[token_ids] * math.sqrt(d_model) + pos_enc[None, :seq, :]
    assert out.shape == (batch, seq, d_model)
    assert jnp.allclose(out, ref, atol=1e-5), "mismatch vs reference"

    print("KERNEL_OK")
</pallas_src>

<mosaic_0001>
module attributes {stable_mosaic.version = 11 : i64} {
  func.func @_embed_vmem_table_kernel(%arg0: i32, %arg1: i32, %arg2: memref<16xi32, #tpu.memory_space<smem>>, %arg3: memref<64x128xf32, #tpu.memory_space<vmem>>, %arg4: memref<8x128xf32, #tpu.memory_space<vmem>>, %arg5: memref<1x8x128xf32, #tpu.memory_space<vmem>>, %arg6: memref<8x128xf32, #tpu.memory_space<vmem>>) attributes {dimension_semantics = [#tpu.dimension_semantics<parallel>, #tpu.dimension_semantics<parallel>], iteration_bounds = array<i64: 1, 2>, scalar_prefetch = 1 : i64, scratch_operands = 1 : i64, tpu.core_type = #tpu.core_type<tc>, window_params = [{pipeline_mode = #tpu.pipeline_mode<synchronous>, transform_indices = @transform_0, window_bounds = array<i64: 64, 128>}, {transform_indices = @transform_1, window_bounds = array<i64: 8, 128>}, {transform_indices = @transform_2, window_bounds = array<i64: 1, 8, 128>}]} {
    %c8_i32 = arith.constant 8 : i32
    %0 = arith.muli %arg1, %c8_i32 : i32
    %c8_i32_0 = arith.constant 8 : i32
    %1 = arith.muli %arg0, %c8_i32_0 : i32
    %2 = arith.addi %0, %1 : i32
    %c0_i32 = arith.constant 0 : i32
    %3 = arith.addi %2, %c0_i32 : i32
    %4 = arith.index_cast %3 : i32 to index
    %5 = memref.load %arg2[%4] : memref<16xi32, #tpu.memory_space<smem>>
    %6 = arith.index_cast %5 : i32 to index
    %c0 = arith.constant 0 : index
    %7 = vector.load %arg3[%6, %c0] : memref<64x128xf32, #tpu.memory_space<vmem>>, vector<1x128xf32>
    %8 = arith.index_cast %c0_i32 : i32 to index
    %c0_1 = arith.constant 0 : index
    %9 = vector.load %arg6[%8, %c0_1] : memref<8x128xf32, #tpu.memory_space<vmem>>, vector<1x128xf32>
    tpu.vector_store %arg6[%8, %c0_1], %7 {strides = array<i32>} : memref<8x128xf32, #tpu.memory_space<vmem>>, vector<1x128xf32>,
    %c1_i32 = arith.constant 1 : i32
    %10 = arith.addi %2, %c1_i32 : i32
    %11 = arith.index_cast %10 : i32 to index
    %12 = memref.load %arg2[%11] : memref<16xi32, #tpu.memory_space<smem>>
    %13 = arith.index_cast %12 : i32 to index
    %c0_2 = arith.constant 0 : index
    %14 = vector.load %arg3[%13, %c0_2] : memref<64x128xf32, #tpu.memory_space<vmem>>, vector<1x128xf32>
    %15 = arith.index_cast %c1_i32 : i32 to index
    %c0_3 = arith.constant 0 : index
    %16 = vector.load %arg6[%15, %c0_3] : memref<8x128xf32, #tpu.memory_space<vmem>>, vector<1x128xf32>
    tpu.vector_store %arg6[%15, %c0_3], %14 {strides = array<i32>} : memref<8x128xf32, #tpu.memory_space<vmem>>, vector<1x128xf32>,
    %c2_i32 = arith.constant 2 : i32
    %17 = arith.addi %2, %c2_i32 : i32
    %18 = arith.index_cast %17 : i32 to index
    %19 = memref.load %arg2[%18] : memref<16xi32, #tpu.memory_space<smem>>
    %20 = arith.index_cast %19 : i32 to index
    %c0_4 = arith.constant 0 : index
    %21 = vector.load %arg3[%20, %c0_4] : memref<64x128xf32, #tpu.memory_space<vmem>>, vector<1x128xf32>
    %22 = arith.index_cast %c2_i32 : i32 to index
    %c0_5 = arith.constant 0 : index
    %23 = vector.load %arg6[%22, %c0_5] : memref<8x128xf32, #tpu.memory_space<vmem>>, vector<1x128xf32>
    tpu.vector_store %arg6[%22, %c0_5], %21 {strides = array<i32>} : memref<8x128xf32, #tpu.memory_space<vmem>>, vector<1x128xf32>,
    %c3_i32 = arith.constant 3 : i32
    %24 = arith.addi %2, %c3_i32 : i32
    %25 = arith.index_cast %24 : i32 to index
    %26 = memref.load %arg2[%25] : memref<16xi32, #tpu.memory_space<smem>>
    %27 = arith.index_cast %26 : i32 to index
    %c0_6 = arith.constant 0 : index
    %28 = vector.load %arg3[%27, %c0_6] : memref<64x128xf32, #tpu.memory_space<vmem>>, vector<1x128xf32>
    %29 = arith.index_cast %c3_i32 : i32 to index
    %c0_7 = arith.constant 0 : index
    %30 = vector.load %arg6[%29, %c0_7] : memref<8x128xf32, #tpu.memory_space<vmem>>, vector<1x128xf32>
    tpu.vector_store %arg6[%29, %c0_7], %28 {strides = array<i32>} : memref<8x128xf32, #tpu.memory_space<vmem>>, vector<1x128xf32>,
    %c4_i32 = arith.constant 4 : i32
    %31 = arith.addi %2, %c4_i32 : i32
    %32 = arith.index_cast %31 : i32 to index
    %33 = memref.load %arg2[%32] : memref<16xi32, #tpu.memory_space<smem>>
    %34 = arith.index_cast %33 : i32 to index
    %c0_8 = arith.constant 0 : index
    %35 = vector.load %arg3[%34, %c0_8] : memref<64x128xf32, #tpu.memory_space<vmem>>, vector<1x128xf32>
    %36 = arith.index_cast %c4_i32 : i32 to index
    %c0_9 = arith.constant 0 : index
    %37 = vector.load %arg6[%36, %c0_9] : memref<8x128xf32, #tpu.memory_space<vmem>>, vector<1x128xf32>
    tpu.vector_store %arg6[%36, %c0_9], %35 {strides = array<i32>} : memref<8x128xf32, #tpu.memory_space<vmem>>, vector<1x128xf32>,
    %c5_i32 = arith.constant 5 : i32
    %38 = arith.addi %2, %c5_i32 : i32
    %39 = arith.index_cast %38 : i32 to index
    %40 = memref.load %arg2[%39] : memref<16xi32, #tpu.memory_space<smem>>
    %41 = arith.index_cast %40 : i32 to index
    %c0_10 = arith.constant 0 : index
    %42 = vector.load %arg3[%41, %c0_10] : memref<64x128xf32, #tpu.memory_space<vmem>>, vector<1x128xf32>
    %43 = arith.index_cast %c5_i32 : i32 to index
    %c0_11 = arith.constant 0 : index
    %44 = vector.load %arg6[%43, %c0_11] : memref<8x128xf32, #tpu.memory_space<vmem>>, vector<1x128xf32>
    tpu.vector_store %arg6[%43, %c0_11], %42 {strides = array<i32>} : memref<8x128xf32, #tpu.memory_space<vmem>>, vector<1x128xf32>,
    %c6_i32 = arith.constant 6 : i32
    %45 = arith.addi %2, %c6_i32 : i32
    %46 = arith.index_cast %45 : i32 to index
    %47 = memref.load %arg2[%46] : memref<16xi32, #tpu.memory_space<smem>>
    %48 = arith.index_cast %47 : i32 to index
    %c0_12 = arith.constant 0 : index
    %49 = vector.load %arg3[%48, %c0_12] : memref<64x128xf32, #tpu.memory_space<vmem>>, vector<1x128xf32>
    %50 = arith.index_cast %c6_i32 : i32 to index
    %c0_13 = arith.constant 0 : index
    %51 = vector.load %arg6[%50, %c0_13] : memref<8x128xf32, #tpu.memory_space<vmem>>, vector<1x128xf32>
    tpu.vector_store %arg6[%50, %c0_13], %49 {strides = array<i32>} : memref<8x128xf32, #tpu.memory_space<vmem>>, vector<1x128xf32>,
    %c7_i32 = arith.constant 7 : i32
    %52 = arith.addi %2, %c7_i32 : i32
    %53 = arith.index_cast %52 : i32 to index
    %54 = memref.load %arg2[%53] : memref<16xi32, #tpu.memory_space<smem>>
    %55 = arith.index_cast %54 : i32 to index
    %c0_14 = arith.constant 0 : index
    %56 = vector.load %arg3[%55, %c0_14] : memref<64x128xf32, #tpu.memory_space<vmem>>, vector<1x128xf32>
    %57 = arith.index_cast %c7_i32 : i32 to index
    %c0_15 = arith.constant 0 : index
    %58 = vector.load %arg6[%57, %c0_15] : memref<8x128xf32, #tpu.memory_space<vmem>>, vector<1x128xf32>
    tpu.vector_store %arg6[%57, %c0_15], %56 {strides = array<i32>} : memref<8x128xf32, #tpu.memory_space<vmem>>, vector<1x128xf32>,
    %c8_i32_16 = arith.constant 8 : i32
    %c0_17 = arith.constant 0 : index
    %c0_18 = arith.constant 0 : index
    %59 = vector.load %arg6[%c0_17, %c0_18] : memref<8x128xf32, #tpu.memory_space<vmem>>, vector<8x128xf32>
    %cst = arith.constant 11.3137083 : f32
    %60 = vector.broadcast %cst : f32 to vector<8x128xf32>
    %61 = arith.mulf %59, %60 : vector<8x128xf32>
    %c0_19 = arith.constant 0 : index
    %c0_20 = arith.constant 0 : index
    %62 = vector.load %arg4[%c0_19, %c0_20] : memref<8x128xf32, #tpu.memory_space<vmem>>, vector<8x128xf32>
    %63 = arith.addf %61, %62 : vector<8x128xf32>
    %c0_21 = arith.constant 0 : index
    %c0_22 = arith.constant 0 : index
    %c0_23 = arith.constant 0 : index
    %64 = vector.load %arg5[%c0_21, %c0_22, %c0_23] : memref<1x8x128xf32, #tpu.memory_space<vmem>>, vector<1x8x128xf32>
    %65 = vector.shape_cast %64 : vector<1x8x128xf32> to vector<8x128xf32>
    %66 = vector.shape_cast %63 : vector<8x128xf32> to vector<1x8x128xf32>
    tpu.vector_store %arg5[%c0_21, %c0_22, %c0_23], %66 {strides = array<i32>} : memref<1x8x128xf32, #tpu.memory_space<vmem>>, vector<1x8x128xf32>,
    return
  }
  func.func @transform_0(%arg0: i32, %arg1: i32, %arg2: memref<16xi32, #tpu.memory_space<smem>>) -> (i32, i32) {
    %c0_i32 = arith.constant 0 : i32
    %c0_i32_0 = arith.constant 0 : i32
    %c0_i32_1 = arith.constant 0 : i32
    return %c0_i32, %c0_i32_0 : i32, i32
  }
  func.func @transform_1(%arg0: i32, %arg1: i32, %arg2: memref<16xi32, #tpu.memory_space<smem>>) -> (i32, i32) {
    %c0_i32 = arith.constant 0 : i32
    %c0_i32_0 = arith.constant 0 : i32
    return %arg0, %c0_i32 : i32, i32
  }
  func.func @transform_2(%arg0: i32, %arg1: i32, %arg2: memref<16xi32, #tpu.memory_space<smem>>) -> (i32, i32, i32) {
    %c0_i32 = arith.constant 0 : i32
    %c0_i32_0 = arith.constant 0 : i32
    return %arg1, %arg0, %c0_i32 : i32, i32, i32
  }
}

</mosaic_0001>

<bundles_post_ra>
// kernel: tpu_custom_call.1
= control target key start
LH: loop header
LB: loop body
LE: loop exit
PB: predicated region body
PF: predicated region fallthrough
CT: control target
= control target key end

     0   :  { %s796_s0 = inlined_call_operand.hbm [shape: s32[16], index: 0, kind: input, shape index: {}]   ;;  %s797_s1 = inlined_call_operand.hbm [shape: f32[64,128], index: 1, kind: input, shape index: {}]   ;;  %s798_s2 = inlined_call_operand.hbm [shape: f32[8,128], index: 2, kind: input, shape index: {}]   ;;  %s799_s3 = inlined_call_operand.hbm [shape: f32[2,8,128], index: 3, kind: output, shape index: {}]  }
   0x1   :  { %s419_s14 = scalar_lea.hbm %s796_s0, 16 }
   0x2   :  { %p420_p0 = scmp.ne.s32.totalorder %s796_s0, %s419_s14  ;;  %p423_p1 = scmp.lt.u32.totalorder %s419_s14, %s796_s0 }
   0x4   :  { %p425_p2 = pnand %p423_p1, %p420_p0 }
   0x6   :  { %428 = shalt.err (!%p425_p2)  }
   0x7   :  { %s575_s19 = smov [#allocation4]  }
   0x8   :  { %9 = dma.hbm_to_smem %s796_s0, 16, %s575_s19, [#allocation3] }
   0x9   :  { %537 = dma.done.wait [#allocation3], 16 }
   0xa   :  { %538 = vsyncadd [#allocation3], 4294967280 }
   0xb   :  { %11 = sfence }
   0xc   :  { %12 = vsyncpa [#allocation6], 0 }
   0xd   :  { %13 = vsyncpa [#allocation9], 0 }
   0xe   :  { %14 = vsyncpa [#allocation7], 0 }
   0xf   :  { %16 = vsyncpa [#allocation7 + $0x1], 0  ;;  %s613_s22 = smov 0   ;;  %s615_s23 = smov 0  }
  0x10   :  { %s617_s24 = smov 0   ;;  %s619_s25 = smov 0  }
  0x11   :  { %s621_s26 = smov 0   ;;  %s623_s27 = smov 0  }
  0x12 LB: > { %s326_s0 = sadd.s32 4294967295, %s573_s27   ;;  %s327_s28 = sadd.s32 4294967294, %s573_s27   ;;  %s573_s27 = sphi %s623_s27, %s22_s27   ;;  %s569_s26 = sphi %s621_s26, %s817_s26   ;;  %s565_s25 = sphi %s619_s25, %s816_s25   ;;  %s561_s24 = sphi %s617_s24, %s815_s24   ;;  %s557_s23 = sphi %s615_s23, %s814_s23   ;;  %s553_s22 = sphi %s613_s22, %s813_s22  }
  0x13   : > { %s31_s29 = sadd.s32 1, %s569_s26  ;;  %s90_s30 = sadd.s32 1, %s561_s24 }
  0x14   : > { %p32_p3 = scmp.ge.s32.totalorder %s31_s29, 2  ;;  %p100_p4 = scmp.ne.s32.totalorder %s561_s24, %s557_s23 }
  0x15   : > { %p101_p5 = scmp.eq.s32.totalorder %s326_s0, 1  ;;  %p106_p6 = scmp.ne.s32.totalorder %s557_s23, %s553_s22 }
  0x16   : > { %s819_s29 = smov (%p32_p3, %s31_s29), 0  ;;  %p107_p8 = scmp.eq.s32.totalorder %s327_s28, 1 }
  0x17   : > { %p653_p7 = por %p101_p5, %p100_p4  ;;  %s85_s5 = ssub.s32 %s569_s26, %s819_s29 }
  0x18   : > { %p328_p9 = scmp.ge.s32.totalorder %s573_s27, 1  ;;  %p88_p10 = scmp.eq.s32.totalorder %s85_s5, 0 }
  0x19   : > { %s804_s4 = scalar_select %p653_p7, 1, 0 }
  0x1a   : > { %p660_p11 = por %p107_p8, %p106_p6  ;;  %p114_p12 = scmp.lt.s32.totalorder %s573_s27, 3 }
  0x1b   : > { %s666_s7 = scalar_select %p88_p10, %s561_s24, %s90_s30  }
  0x1c   : > { %s805_s6 = scalar_select %p660_p11, 1, 0 }
  0x1d   : > { %p668_p13 = pnand %p328_p9, %p114_p12  ;;  %p672_p0 = scmp.eq.s32.totalorder %s326_s0, 0 }
  0x1e   : > { %s576_s10 = smov [#allocation5]   ;;  %s577_s13 = smov [#allocation8]  }
  0x1f   : > { %s806_s8 = scalar_select %p668_p13, 1, 0 }
  0x20   : > { %s807_s9 = scalar_select %p672_p0, 1, 0 }
  0x21   : > { %p350_p1 = pneg %p668_p13  ;;  %s126_s11 = sshll.u32 %s576_s10, 4  ;;  %s127_s11 = int_to_ptr.vmem [resolvable:$true] %s126_s11 }
  0x22   : > { %s142_s14 = sshll.u32 %s577_s13, 4  ;;  %s429_s17 = scalar_lea.hbm %s797_s1, 1024  ;;  %s684_s14 = int_to_ptr.vmem [resolvable:$true] %s142_s14 }
  0x23   : > { %p680_p2 = pnand %p672_p0, %p350_p1  ;;  %p430_p3 = scmp.ne.s32.totalorder %s797_s1, %s429_s17 }
  0x24   : > { %p436_p8 = scmp.lt.u32.totalorder %s429_s17, %s797_s1 }
  0x25   : > { %p431_p4 = pneg %p680_p2 }
  0x27   : > { %p432_p5 = pnand %p431_p4, %p430_p3 }
  0x29   : > { %p433_p6 = pneg %p432_p5 }
  0x2b   : > { %p438_p9 = pnand %p436_p8, %p433_p6 }
  0x2d   : > { %441 = shalt.err (!%p438_p9)
}
  0x2e   : > { %s442_s0 = scalar_lea.vmem %s127_s11, 1024  ;;  %p450_p11 = scmp.lt.s32.totalorder %s127_s11, %s127_s11 }
  0x2f   : > { %p443_p10 = scmp.ne.s32.totalorder %s127_s11, %s442_s0  ;;  %p451_p7 = scmp.lt.s32.totalorder %s442_s0, %s442_s0 }
  0x31   : > { %p445_p12 = pnand %p443_p10, %p431_p4  ;;  %p452_p0 = por %p451_p7, %p450_p11 }
  0x33   : > { %p446_p1 = pneg %p445_p12 }
  0x35   : > { %p453_p13 = pnand %p452_p0, %p446_p1 }
  0x37   : > { %456 = shalt.err (!%p453_p13)
}
  0x38   : > { %s578_s28 = smov 128   ;;  %s579_s30 = smov 8  }
  0x39   : > { %353 = dma.hbm_to_vmem [thread:$0]  (!%p680_p2), %s797_s1, 1024, %s127_s11, [#allocation6], %s578_s28, %s578_s28, %s579_s30  }
  0x3a   : > { %s457_s16 = scalar_lea.hbm %s798_s2, 128 }
  0x3b   : > { %p458_p3 = scmp.ne.s32.totalorder %s798_s2, %s457_s16  ;;  %p464_p13 = scmp.lt.u32.totalorder %s457_s16, %s798_s2 }
  0x3d   : > { %p460_p7 = pnand %p458_p3, %p431_p4 }
  0x3f   : > { %p461_p11 = pneg %p460_p7 }
  0x41   : > { %p466_p0 = pnand %p464_p13, %p461_p11 }
  0x43   : > { %469 = shalt.err (!%p466_p0)
}
  0x44   : > { %s470_s11 = scalar_lea.vmem %s684_s14, 128  ;;  %p478_p9 = scmp.lt.s32.totalorder %s684_s14, %s684_s14 }
  0x45   : > { %p471_p5 = scmp.ne.s32.totalorder %s684_s14, %s470_s11  ;;  %p479_p10 = scmp.lt.s32.totalorder %s470_s11, %s470_s11 }
  0x47   : > { %p473_p6 = pnand %p471_p5, %p431_p4  ;;  %p480_p12 = por %p479_p10, %p478_p9 }
  0x49   : > { %p474_p8 = pneg %p473_p6 }
  0x4b   : > { %p481_p1 = pnand %p480_p12, %p474_p8 }
  0x4d   : > { %484 = shalt.err (!%p481_p1)
}
  0x4e   : > { %356 = dma.hbm_to_vmem [thread:$0]  (!%p680_p2), %s798_s2, 128, %s684_s14, [#allocation9]  }
  0x4f   : > { %p809_p3 = scmp.ne.s32.totalorder %s806_s8, 0 }
  0x50   : > { %p810_p7 = scmp.ne.s32.totalorder (!%p809_p3), %s807_s9, 0 }
  0x51   : > { %155 = sbr.rel (%p809_p3) target bundleno = 134 (0x86), region = 28 }
  0x58   : > { %540 = dma.done.wait (%p810_p7), [#allocation6], 1024  }
  0x59   : > { %542 = vsyncadd (%p810_p7), [#allocation6], 4294966272 }
  0x5a   : > { %544 = dma.done.wait (%p810_p7), [#allocation9], 128  }
  0x5b   : > { %546 = vsyncadd (%p810_p7), [#allocation9], 4294967168  ;;  %s335_s12 = sshll.u32 %s565_s25, 3  ;;  %v220_v9 = vld [vmem:[#allocation8] sm:$0xff]  ;;  %p811_p4 = scmp.ne.s32.totalorder %s804_s4, 0 }
  0x5c   : > { %s179_s28 = sld [smem:[#allocation4 + %s335_s12]]  ;;  %s183_s30 = sadd.s32 1, %s335_s12 }
  0x5d   : > { %s184_s14 = sld [smem:[#allocation4 + %s183_s30]]  ;;  %s188_s5 = sadd.s32 2, %s335_s12 }
  0x5e   : > { %s189_s8 = sld [smem:[#allocation4 + %s188_s5]]  ;;  %s193_s10 = sadd.s32 3, %s335_s12 }
  0x5f   : > { %s194_s13 = sld [smem:[#allocation4 + %s193_s10]]  ;;  %s198_s15 = sadd.s32 4, %s335_s12 }
  0x60   : > { %s199_s16 = sld [smem:[#allocation4 + %s198_s15]]  ;;  %s203_s17 = sadd.s32 5, %s335_s12 }
  0x61   : > { %s204_s18 = sld [smem:[#allocation4 + %s203_s17]]  ;;  %s208_s19 = sadd.s32 6, %s335_s12 }
  0x62   : > { %s209_s20 = sld [smem:[#allocation4 + %s208_s19]]  ;;  %s180_s11 = scalar_lea.vmem [#allocation5], %s179_s28 }
  0x63   : > { %v181_v0 = vld [vmem:[%s180_s11] sm:$0x1]  ;;  %s213_s21 = sadd.s32 7, %s335_s12  ;;  %s185_s9 = scalar_lea.vmem [#allocation5], %s184_s14 }
  0x64   : > { %182 = vst [vmem:[#allocation2] sm:$0x1] %v181_v0  ;;  %v186_v1 = vld [vmem:[%s185_s9] sm:$0x1]  ;;  %s214_s0 = sld [smem:[#allocation4 + %s213_s21]]  ;;  %s190_s30 = scalar_lea.vmem [#allocation5], %s189_s8 }
  0x65   : > { %187 = vst [vmem:[#allocation2 + $0x1] sm:$0x1] %v186_v1  ;;  %v191_v2 = vld [vmem:[%s190_s30] sm:$0x1]  ;;  %s195_s5 = scalar_lea.vmem [#allocation5], %s194_s13  ;;  %s173_s28 = sand.u32 1, %s557_s23  }
  0x66   : > { %192 = vst [vmem:[#allocation2 + $0x2] sm:$0x1] %v191_v2  ;;  %v196_v3 = vld [vmem:[%s195_s5] sm:$0x1]  ;;  %s200_s10 = scalar_lea.vmem [#allocation5], %s199_s16  ;;  %s334_s8 = sshll.u32 %s173_s28, 3 }
  0x67   : > { %197 = vst [vmem:[#allocation2 + $0x3] sm:$0x1] %v196_v3  ;;  %v201_v4 = vld [vmem:[%s200_s10] sm:$0x1]  ;;  %s205_s15 = scalar_lea.vmem [#allocation5], %s204_s18  ;;  %s175_s13 = scalar_lea.vmem [#allocation10], %s334_s8 }
  0x68   : > { %202 = vst [vmem:[#allocation2 + $0x4] sm:$0x1] %v201_v4  ;;  %v206_v5 = vld [vmem:[%s205_s15] sm:$0x1]  ;;  %s210_s12 = scalar_lea.vmem [#allocation5], %s209_s20  ;;  %s238_s17 = sshll.u32 %s175_s13, 4  ;;  %s746_s17 = int_to_ptr.vmem [resolvable:$true] %s238_s17 }
  0x69   : > { %207 = vst [vmem:[#allocation2 + $0x5] sm:$0x1] %v206_v5  ;;  %v211_v6 = vld [vmem:[%s210_s12] sm:$0x1]  ;;  %s337_s16 = sshll.u32 %s565_s25, 7  ;;  %s224_s11 = scalar_lea.sflag [#allocation7], %s173_s28 }
  0x6a   : > { %212 = vst [vmem:[#allocation2 + $0x6] sm:$0x1] %v211_v6  ;;  %s215_s14 = scalar_lea.vmem [#allocation5], %s214_s0  ;;  %s751_s20 = scalar_lea.hbm %s799_s3, %s337_s16 }
  0x6b   : > { %v216_v7 = vld [vmem:[%s215_s14] sm:$0x1]  ;;  %s485_s21 = scalar_lea.vmem %s746_s17, 128  ;;  %s580_s25 = smov [#allocation10]  }
  0x6c   : > { %217 = vst [vmem:[#allocation2 + $0x7] sm:$0x1] %v216_v7  ;;  %p486_p2 = scmp.ne.s32.totalorder %s746_s17, %s485_s21  ;;  %s489_s9 = sshll.u32 %s580_s25, 4  ;;  %s490_s9 = int_to_ptr.vmem [resolvable:$false] %s489_s9 }
  0x6d   : > { %s491_s0 = scalar_lea.vmem %s490_s9, 256  ;;  %p492_p0 = scmp.lt.s32.totalorder %s746_s17, %s490_s9 }
  0x6e   : > { %p487_p11 = pnand %p486_p2, %p811_p4  ;;  %p493_p5 = scmp.lt.s32.totalorder %s491_s0, %s485_s21 }
  0x70   : > { %p488_p13 = pneg %p487_p11  ;;  %p494_p6 = por %p493_p5, %p492_p0 }
  0x72   : > { %p495_p8 = pnand %p494_p6, %p488_p13 }
  0x73   : > { %v218_v8 = vld [vmem:[#allocation2] sm:$0xff] }
  0x74   : > { %v219_v10 = vmul.f32 11.313708, %v218_v8 }
  0x76   : > { %v221_v11 = vadd.f32 %v220_v9, %v219_v10 }
  0x78   : > { %222 = vst [vmem:[%s175_s13] sm:$0xff] %v221_v11 }
  0x79   : > { %498 = shalt.err (!%p495_p8)
}
  0x7a   : > { %s499_s30 = scalar_lea.hbm %s751_s20, 128  ;;  %s503_s15 = scalar_lea.hbm %s799_s3, 256 }
  0x7b   : > { %p500_p9 = scmp.ne.s32.totalorder %s751_s20, %s499_s30  ;;  %p504_p1 = scmp.lt.u32.totalorder %s751_s20, %s799_s3 }
  0x7c   : > { %p505_p3 = scmp.lt.u32.totalorder %s503_s15, %s499_s30  ;;  %p507_p2 = scmp.lt.u32.totalorder %s499_s30, %s751_s20 }
  0x7d   : > { %p501_p10 = pnand %p500_p9, %p811_p4 }
  0x7e   : > { %p506_p7 = por %p505_p3, %p504_p1 }
  0x7f   : > { %p502_p12 = pneg %p501_p10 }
  0x80   : > { %p508_p11 = por %p507_p2, %p506_p7 }
  0x82   : > { %p509_p13 = pnand %p508_p11, %p502_p12 }
  0x84   : > { %512 = shalt.err (!%p509_p13)
}
  0x85   : > { %348 = dma.vmem_to_hbm [thread:$0]  (%p811_p4), %s746_s17, 128, %s751_s20, %s224_s11  }
  0x86 PF: > { %p365_p0 = scmp.ge.s32.totalorder %s573_s27, 2  ;;  %s250_s14 = sand.u32 1, %s553_s22  }
  0x87   : > { %p812_p5 = scmp.ne.s32.totalorder %s805_s6, 0  ;;  %s251_s8 = scalar_lea.sflag [#allocation7], %s250_s14 }
  0x89   : > { %p358_p6 = pnand %p365_p0, %p812_p5 }
  0x8b   : > { %548 = dma.done.wait (!%p358_p6), %s251_s8, 128  }
  0x8c   : > { %550 = vsyncadd (!%p358_p6), %s251_s8, 4294967168  ;;  %s22_s27 = sadd.s32 1, %s573_s27   ;;  %s813_s22 = smov %s557_s23 }
  0x8d   : > { %p19_p8 = scmp.ge.s32.totalorder %s22_s27, 4   ;;  %s814_s23 = smov %s561_s24 }
  0x8e   : > { %s815_s24 = smov %s666_s7  ;;  %s816_s25 = smov %s569_s26 }
  0x8f   : > { %s817_s26 = smov %s819_s29  ;;  %21 = sbr.rel (!%p19_p8) target bundleno = 18 (0x12), region = 78 }
  0x96   :  { %256 = vsyncpa [#allocation6], 1 }
  0x97   :  { %258 = vsyncpa [#allocation6 + $0x1], 1 }
  0x98   :  { %259 = vsyncpa [#allocation9], 1 }
  0x99   :  { %260 = vsyncpa [#allocation7], 1 }
  0x9a   :  { %262 = vsyncpa [#allocation7 + $0x1], 1 }

</bundles_post_ra>
